<compile_context>
chip_gen: v5e
topology: v5e:2x2
jax: 0.10.0
libtpu: 0.0.40
codegen_flags: <defaults>
</compile_context>

<pallas_src>
import math
import jax
import jax.numpy as jnp
from jax import lax
from jax.experimental import pallas as pl
from jax.experimental.pallas import tpu as pltpu


# ----------------------------------------------------------------------------
# helpers
# ----------------------------------------------------------------------------
def _tile(dim, target):
    """Largest tile <= target that divides dim (full dim if dim <= target)."""
    if dim <= target:
        return dim
    for t in range(target, 0, -1):
        if dim % t == 0:
            return t
    return dim


# ----------------------------------------------------------------------------
# tiled linear:  y = x @ W + b
# ----------------------------------------------------------------------------
def _linear_kernel(x_ref, w_ref, b_ref, o_ref, acc_ref):
    kk = pl.program_id(2)

    @pl.when(kk == 0)
    def _init():
        acc_ref[...] = jnp.zeros_like(acc_ref)

    acc_ref[...] += jnp.dot(x_ref[...], w_ref[...],
                            preferred_element_type=jnp.float32)

    @pl.when(kk == pl.num_programs(2) - 1)
    def _finalize():
        o_ref[...] = (acc_ref[...] + b_ref[...].astype(jnp.float32)
                      ).astype(o_ref.dtype)


def linear(x2d, w, b, *, out_dtype, tm=256, tn=256, tk=512):
    """x2d: (M, K), w: (K, N), b: (N,) f32 -> (M, N) out_dtype."""
    M, K = x2d.shape
    N = w.shape[1]
    tm, tn, tk = _tile(M, tm), _tile(N, tn), _tile(K, tk)
    grid = (M // tm, N // tn, K // tk)
    return pl.pallas_call(
        _linear_kernel,
        out_shape=jax.ShapeDtypeStruct((M, N), out_dtype),
        grid_spec=pltpu.PrefetchScalarGridSpec(
            num_scalar_prefetch=0,
            grid=grid,
            in_specs=[
                pl.BlockSpec((tm, tk), lambda i, j, kk: (i, kk)),
                pl.BlockSpec((tk, tn), lambda i, j, kk: (kk, j)),
                pl.BlockSpec((1, tn), lambda i, j, kk: (0, j)),
            ],
            out_specs=pl.BlockSpec((tm, tn), lambda i, j, kk: (i, j)),
            scratch_shapes=[pltpu.VMEM((tm, tn), jnp.float32)],
        ),
        compiler_params=pltpu.CompilerParams(
            dimension_semantics=("parallel", "parallel", "arbitrary")),
    )(x2d, w, b.reshape(1, N).astype(jnp.float32))


# ----------------------------------------------------------------------------
# flash-style attention (no weights materialized), online softmax
#   q/k/v: (B*H, L, D);  q is already pre-scaled (scaling folded into wq/bq)
# ----------------------------------------------------------------------------
def _flash_kernel(q_ref, k_ref, v_ref, o_ref, m_sc, l_sc, acc_sc):
    ki = pl.program_id(2)

    @pl.when(ki == 0)
    def _init():
        m_sc[...] = jnp.full_like(m_sc, -jnp.inf)
        l_sc[...] = jnp.zeros_like(l_sc)
        acc_sc[...] = jnp.zeros_like(acc_sc)

    q = q_ref[0]                                        # (tq, D)
    k = k_ref[0]                                        # (tk, D)
    v = v_ref[0]                                        # (tk, D)

    # scores: contract over D without materializing k.T
    s = lax.dot_general(q, k, (((1,), (1,)), ((), ())),
                        preferred_element_type=jnp.float32)      # (tq, tk)

    m_prev = m_sc[...]
    m_new = jnp.maximum(m_prev, jnp.max(s, axis=-1, keepdims=True))
    alpha = jnp.exp(m_prev - m_new)
    p = jnp.exp(s - m_new)
    l_sc[...] = alpha * l_sc[...] + jnp.sum(p, axis=-1, keepdims=True)
    acc_sc[...] = alpha * acc_sc[...] + jnp.dot(
        p.astype(v.dtype), v, preferred_element_type=jnp.float32)
    m_sc[...] = m_new

    @pl.when(ki == pl.num_programs(2) - 1)
    def _finalize():
        # approx=True would move the divide to the EUP but loosens tolerance.
        inv_l = pl.reciprocal(l_sc[...], approx=False)
        o_ref[0] = (acc_sc[...] * inv_l).astype(o_ref.dtype)


def flash_attention(q, k, v, *, tq=256, tk=256):
    BH, Lq, D = q.shape
    Lk = k.shape[1]
    tq, tk = _tile(Lq, tq), _tile(Lk, tk)
    grid = (BH, Lq // tq, Lk // tk)
    return pl.pallas_call(
        _flash_kernel,
        out_shape=jax.ShapeDtypeStruct((BH, Lq, D), q.dtype),
        grid_spec=pltpu.PrefetchScalarGridSpec(
            num_scalar_prefetch=0,
            grid=grid,
            in_specs=[
                pl.BlockSpec((1, tq, D), lambda b, qi, ki: (b, qi, 0)),
                pl.BlockSpec((1, tk, D), lambda b, qi, ki: (b, ki, 0)),
                pl.BlockSpec((1, tk, D), lambda b, qi, ki: (b, ki, 0)),
            ],
            out_specs=pl.BlockSpec((1, tq, D), lambda b, qi, ki: (b, qi, 0)),
            scratch_shapes=[
                pltpu.VMEM((tq, 1), jnp.float32),   # running max
                pltpu.VMEM((tq, 1), jnp.float32),   # running denominator
                pltpu.VMEM((tq, D), jnp.float32),   # output accumulator
            ],
        ),
        compiler_params=pltpu.CompilerParams(
            dimension_semantics=("parallel", "parallel", "arbitrary")),
    )(q, k, v)


# ----------------------------------------------------------------------------
# attention that also materializes the softmax weights (module default path)
# tiled over (B*H, Lq); full Lk row per step because weights need exact softmax
# ----------------------------------------------------------------------------
def _attn_weights_kernel(q_ref, k_ref, v_ref, o_ref, w_ref):
    q = q_ref[0]                                        # (tq, D), pre-scaled
    k = k_ref[0]                                        # (Lk, D)
    v = v_ref[0]                                        # (Lk, D)
    s = lax.dot_general(q, k, (((1,), (1,)), ((), ())),
                        preferred_element_type=jnp.float32)      # (tq, Lk)
    s = s - jnp.max(s, axis=-1, keepdims=True)
    e = jnp.exp(s)
    p = e * pl.reciprocal(jnp.sum(e, axis=-1, keepdims=True), approx=False)
    w_ref[0] = p.astype(w_ref.dtype)
    o_ref[0] = jnp.dot(p.astype(v.dtype), v,
                       preferred_element_type=jnp.float32).astype(o_ref.dtype)


def attention_with_weights(q, k, v, *, weights_dtype, tq=256):
    BH, Lq, D = q.shape
    Lk = k.shape[1]
    tq = _tile(Lq, tq)
    grid = (BH, Lq // tq)
    return pl.pallas_call(
        _attn_weights_kernel,
        out_shape=(
            jax.ShapeDtypeStruct((BH, Lq, D), q.dtype),
            jax.ShapeDtypeStruct((BH, Lq, Lk), weights_dtype),
        ),
        grid_spec=pltpu.PrefetchScalarGridSpec(
            num_scalar_prefetch=0,
            grid=grid,
            in_specs=[
                pl.BlockSpec((1, tq, D), lambda b, qi: (b, qi, 0)),
                pl.BlockSpec((1, Lk, D), lambda b, qi: (b, 0, 0)),
                pl.BlockSpec((1, Lk, D), lambda b, qi: (b, 0, 0)),
            ],
            out_specs=(
                pl.BlockSpec((1, tq, D), lambda b, qi: (b, qi, 0)),
                pl.BlockSpec((1, tq, Lk), lambda b, qi: (b, qi, 0)),
            ),
        ),
        compiler_params=pltpu.CompilerParams(
            dimension_semantics=("parallel", "parallel")),
    )(q, k, v)


# ----------------------------------------------------------------------------
# MultiheadAttention forward
# ----------------------------------------------------------------------------
def multihead_attention_forward(params, query, key, value, num_heads,
                                *, compute_dtype=jnp.bfloat16,
                                need_weights=True):
    bsz, tgt_len, embed_dim = query.shape
    src_len = key.shape[1]
    head_dim = embed_dim // num_heads
    scaling = head_dim ** (-0.5)
    out_dtype = query.dtype
    cd = compute_dtype

    # Fold scaling into the q projection once (weights + bias).
    wq = (params["wq"] * scaling).astype(cd)
    bq = params["bq"] * scaling
    wk, bk = params["wk"].astype(cd), params["bk"]
    wv, bv = params["wv"].astype(cd), params["bv"]
    wo, bo = params["wo"].astype(cd), params["bo"]

    q2 = linear(query.reshape(bsz * tgt_len, embed_dim).astype(cd), wq, bq,
                out_dtype=cd)
    k2 = linear(key.reshape(bsz * src_len, embed_dim).astype(cd), wk, bk,
                out_dtype=cd)
    v2 = linear(value.reshape(bsz * src_len, embed_dim).astype(cd), wv, bv,
                out_dtype=cd)

    # (b*l, e) -> (b*h, l, d)
    def split_heads(x2, L):
        return (x2.reshape(bsz, L, num_heads, head_dim)
                  .transpose(0, 2, 1, 3)
                  .reshape(bsz * num_heads, L, head_dim))

    qh = split_heads(q2, tgt_len)
    kh = split_heads(k2, src_len)
    vh = split_heads(v2, src_len)

    if need_weights:
        attn, w = attention_with_weights(qh, kh, vh, weights_dtype=cd)
        attn_weights = (w.reshape(bsz, num_heads, tgt_len, src_len)
                         .transpose(1, 0, 2, 3))
    else:
        attn = flash_attention(qh, kh, vh)
        attn_weights = None

    # (b*h, tgt, d) -> (b, tgt, h*d)
    attn = (attn.reshape(bsz, num_heads, tgt_len, head_dim)
                .transpose(0, 2, 1, 3)
                .reshape(bsz * tgt_len, embed_dim))

    out = linear(attn, wo, bo, out_dtype=cd).reshape(bsz, tgt_len, embed_dim)
    return out.astype(out_dtype), attn_weights


# ----------------------------------------------------------------------------
# pure-JAX reference for sanity checking (f32)
# ----------------------------------------------------------------------------
def reference_forward(params, query, key, value, num_heads):
    bsz, tgt_len, embed_dim = query.shape
    src_len = key.shape[1]
    head_dim = embed_dim // num_heads
    scaling = head_dim ** (-0.5)

    q = query @ params["wq"] + params["bq"]
    k = key @ params["wk"] + params["bk"]
    v = value @ params["wv"] + params["bv"]

    def sh(x, L):
        return x.reshape(bsz, L, num_heads, head_dim).transpose(0, 2, 1, 3)

    qh, kh, vh = sh(q, tgt_len), sh(k, src_len), sh(v, src_len)
    s = jnp.einsum("bhqd,bhkd->bhqk", qh * scaling, kh)
    p = jax.nn.softmax(s.astype(jnp.float32), axis=-1)
    a = jnp.einsum("bhqk,bhkd->bhqd", p, vh)
    a = a.transpose(0, 2, 1, 3).reshape(bsz, tgt_len, embed_dim)
    out = a @ params["wo"] + params["bo"]
    return out, p.transpose(1, 0, 2, 3)


# ----------------------------------------------------------------------------
def init_params(key, embed_dim):
    ks = jax.random.split(key, 8)
    bound = 1.0 / math.sqrt(embed_dim)

    def w(k):
        return jax.random.uniform(k, (embed_dim, embed_dim), jnp.float32,
                                  -bound, bound)

    def b(k):
        return jax.random.uniform(k, (embed_dim,), jnp.float32, -bound, bound)

    return {
        "wq": w(ks[0]), "bq": b(ks[1]),
        "wk": w(ks[2]), "bk": b(ks[3]),
        "wv": w(ks[4]), "bv": b(ks[5]),
        "wo": w(ks[6]), "bo": b(ks[7]),
    }


if __name__ == "__main__":
    bsz, seq, embed_dim, num_heads = 2, 8, 32, 4

    key = jax.random.PRNGKey(0)
    kp, kx = jax.random.split(key)
    params = init_params(kp, embed_dim)
    x = jax.random.normal(kx, (bsz, seq, embed_dim), jnp.float32)

    ref_out, ref_w = reference_forward(params, x, x, x, num_heads)

    # 1) f32 compute, with attention weights (module default path) — tight.
    out, attn_w = multihead_attention_forward(
        params, x, x, x, num_heads,
        compute_dtype=jnp.float32, need_weights=True)
    out = jax.block_until_ready(out)
    attn_w = jax.block_until_ready(attn_w)
    assert out.shape == (bsz, seq, embed_dim)
    assert attn_w.shape == (num_heads, bsz, seq, seq)
    assert jnp.allclose(out, ref_out, atol=2e-4, rtol=2e-4)
    assert jnp.allclose(attn_w.astype(jnp.float32), ref_w, atol=1e-4, rtol=1e-4)

    # 2) f32 compute, flash path (no weights) — tight on the output.
    out_f, w_none = multihead_attention_forward(
        params, x, x, x, num_heads,
        compute_dtype=jnp.float32, need_weights=False)
    out_f = jax.block_until_ready(out_f)
    assert w_none is None
    assert jnp.allclose(out_f, ref_out, atol=2e-4, rtol=2e-4)

    # 3) bf16 matmuls (f32 accumulation), flash path — loose tolerance.
    out_bf, _ = multihead_attention_forward(
        params, x, x, x, num_heads,
        compute_dtype=jnp.bfloat16, need_weights=False)
    out_bf = jax.block_until_ready(out_bf)
    assert jnp.allclose(out_bf.astype(jnp.float32), ref_out,
                        atol=5e-2, rtol=5e-2)

    print("KERNEL_OK")
</pallas_src>

<mosaic_0001>
module attributes {stable_mosaic.version = 11 : i64} {
  func.func @_linear_kernel(%arg0: i32, %arg1: i32, %arg2: i32, %arg3: memref<16x32xf32, #tpu.memory_space<vmem>>, %arg4: memref<32x32xf32, #tpu.memory_space<vmem>>, %arg5: memref<1x32xf32, #tpu.memory_space<vmem>>, %arg6: memref<16x32xf32, #tpu.memory_space<vmem>>, %arg7: memref<16x32xf32, #tpu.memory_space<vmem>>) attributes {dimension_semantics = [#tpu.dimension_semantics<parallel>, #tpu.dimension_semantics<parallel>, #tpu.dimension_semantics<arbitrary>], iteration_bounds = array<i64: 1, 1, 1>, scalar_prefetch = 0 : i64, scratch_operands = 1 : i64, tpu.core_type = #tpu.core_type<tc>, window_params = [{transform_indices = @transform_0, window_bounds = array<i64: 16, 32>}, {transform_indices = @transform_1, window_bounds = array<i64: 32, 32>}, {transform_indices = @transform_2, window_bounds = array<i64: 1, 32>}, {transform_indices = @transform_3, window_bounds = array<i64: 16, 32>}]} {
    %c0_i32 = arith.constant 0 : i32
    %0 = arith.cmpi eq, %arg2, %c0_i32 : i32
    %1 = arith.extui %0 : i1 to i32
    %c0_i32_0 = arith.constant 0 : i32
    %2 = arith.cmpi ne, %1, %c0_i32_0 : i32
    scf.if %2 {
      %cst_10 = arith.constant 0.000000e+00 : f32
      %12 = vector.broadcast %cst_10 : f32 to vector<16x32xf32>
      %c0_11 = arith.constant 0 : index
      %c0_12 = arith.constant 0 : index
      %13 = vector.load %arg7[%c0_11, %c0_12] : memref<16x32xf32, #tpu.memory_space<vmem>>, vector<16x32xf32>
      tpu.vector_store %arg7[%c0_11, %c0_12], %12 {strides = array<i32>} : memref<16x32xf32, #tpu.memory_space<vmem>>, vector<16x32xf32>,
    } else {
    }
    %c0 = arith.constant 0 : index
    %c0_1 = arith.constant 0 : index
    %3 = vector.load %arg7[%c0, %c0_1] : memref<16x32xf32, #tpu.memory_space<vmem>>, vector<16x32xf32>
    %c0_2 = arith.constant 0 : index
    %c0_3 = arith.constant 0 : index
    %4 = vector.load %arg3[%c0_2, %c0_3] : memref<16x32xf32, #tpu.memory_space<vmem>>, vector<16x32xf32>
    %c0_4 = arith.constant 0 : index
    %c0_5 = arith.constant 0 : index
    %5 = vector.load %arg4[%c0_4, %c0_5] : memref<32x32xf32, #tpu.memory_space<vmem>>, vector<32x32xf32>
    %cst = arith.constant dense<0.000000e+00> : vector<16x32xf32>
    %6 = tpu.matmul %4, %5, %cst {dimension_numbers = #tpu.dot_dimension_numbers<[1], [0], [0], [1], [0, 0, 1, 1], [], []>} : vector<16x32xf32>, vector<32x32xf32>, vector<16x32xf32> -> vector<16x32xf32>
    %7 = arith.addf %3, %6 : vector<16x32xf32>
    %c0_6 = arith.constant 0 : index
    %c0_7 = arith.constant 0 : index
    %8 = vector.load %arg7[%c0_6, %c0_7] : memref<16x32xf32, #tpu.memory_space<vmem>>, vector<16x32xf32>
    tpu.vector_store %arg7[%c0_6, %c0_7], %7 {strides = array<i32>} : memref<16x32xf32, #tpu.memory_space<vmem>>, vector<16x32xf32>,
    %c0_i32_8 = arith.constant 0 : i32
    %9 = arith.cmpi eq, %arg2, %c0_i32_8 : i32
    %10 = arith.extui %9 : i1 to i32
    %c0_i32_9 = arith.constant 0 : i32
    %11 = arith.cmpi ne, %10, %c0_i32_9 : i32
    scf.if %11 {
      %c0_10 = arith.constant 0 : index
      %c0_11 = arith.constant 0 : index
      %12 = vector.load %arg7[%c0_10, %c0_11] : memref<16x32xf32, #tpu.memory_space<vmem>>, vector<16x32xf32>
      %c0_12 = arith.constant 0 : index
      %c0_13 = arith.constant 0 : index
      %13 = vector.load %arg5[%c0_12, %c0_13] : memref<1x32xf32, #tpu.memory_space<vmem>>, vector<1x32xf32>
      %14 = vector.broadcast %13 : vector<1x32xf32> to vector<16x32xf32>
      %15 = arith.addf %12, %14 : vector<16x32xf32>
      %c0_14 = arith.constant 0 : index
      %c0_15 = arith.constant 0 : index
      %16 = vector.load %arg6[%c0_14, %c0_15] : memref<16x32xf32, #tpu.memory_space<vmem>>, vector<16x32xf32>
      tpu.vector_store %arg6[%c0_14, %c0_15], %15 {strides = array<i32>} : memref<16x32xf32, #tpu.memory_space<vmem>>, vector<16x32xf32>,
    } else {
    }
    return
  }
  func.func @transform_0(%arg0: i32, %arg1: i32, %arg2: i32) -> (i32, i32) {
    %c0_i32 = arith.constant 0 : i32
    return %arg0, %arg2 : i32, i32
  }
  func.func @transform_1(%arg0: i32, %arg1: i32, %arg2: i32) -> (i32, i32) {
    %c0_i32 = arith.constant 0 : i32
    return %arg2, %arg1 : i32, i32
  }
  func.func @transform_2(%arg0: i32, %arg1: i32, %arg2: i32) -> (i32, i32) {
    %c0_i32 = arith.constant 0 : i32
    %c0_i32_0 = arith.constant 0 : i32
    return %c0_i32, %arg1 : i32, i32
  }
  func.func @transform_3(%arg0: i32, %arg1: i32, %arg2: i32) -> (i32, i32) {
    %c0_i32 = arith.constant 0 : i32
    return %arg0, %arg1 : i32, i32
  }
}

</mosaic_0001>

<bundles_post_ra>
// kernel: tpu_custom_call.1
= control target key start
LH: loop header
LB: loop body
LE: loop exit
PB: predicated region body
PF: predicated region fallthrough
CT: control target
= control target key end

     0   :  { %8 = vsyncpa [#allocation4], 0  ;;  %s275_s0 = inlined_call_operand.hbm [shape: f32[16,32], index: 0, kind: input, shape index: {}]   ;;  %s276_s1 = inlined_call_operand.hbm [shape: f32[32,32], index: 1, kind: input, shape index: {}]   ;;  %s277_s2 = inlined_call_operand.vmem [shape: f32[1,32], index: 2, kind: input, shape index: {}]   ;;  %s278_s3 = inlined_call_operand.hbm [shape: f32[16,32], index: 3, kind: output, shape index: {}]  }
   0x1   :  { %9 = vsyncpa [#allocation7], 0 }
   0x2   :  { %10 = vsyncpa [#allocation5], 0  ;;  %s15_s14 = sshll.u32 %s275_s0, 4  ;;  %s220_s15 = smov [#allocation3]   ;;  %s16_s14 = int_to_ptr.hbm [resolvable:$true] %s15_s14 }
   0x3   :  { %s17_s16 = sshll.u32 %s220_s15, 4  ;;  %s28_s19 = sshll.u32 %s276_s1, 4  ;;  %s18_s16 = int_to_ptr.vmem [resolvable:$true] %s17_s16  ;;  %s29_s19 = int_to_ptr.hbm [resolvable:$true] %s28_s19 }
   0x4   :  { %s221_s20 = smov 128   ;;  %s222_s21 = smov 8  }
   0x5   :  { %23 = dma.hbm_to_vmem [thread:$0]  %s16_s14, 256, %s18_s16, [#allocation4], %s221_s20, %s221_s20, %s222_s21  }
   0x6   :  { %s223_s22 = smov [#allocation6]  }
   0x7   :  { %s30_s23 = sshll.u32 %s223_s22, 4  ;;  %s31_s23 = int_to_ptr.vmem [resolvable:$true] %s30_s23 }
   0x8   :  { %36 = dma.hbm_to_vmem [thread:$0]  %s29_s19, 512, %s31_s23, [#allocation7], %s221_s20, %s221_s20, %s222_s21  }
   0x9   :  { %214 = dma.done.wait [#allocation4], 256  }
   0xa   :  { %215 = vsyncadd [#allocation4], 4294967040 }
   0xb   :  { %216 = dma.done.wait [#allocation7], 512  }
   0xc   :  { %217 = vsyncadd [#allocation7], 4294966784  ;;  %vm51_vm0 = vcmask 261120   ;;  %v224_v0 = vmov 0.0   ;;  %v61_v1 = vld [vmem:[#allocation6 + $0x18] sm:$0xff]  ;;  %v60_v2 = vld [vmem:[#allocation6 + $0x10] sm:$0xff] }
   0xd   :  { %52 = vst.msk [vmem:[#allocation2] sm:$0xff] %vm51_vm0, %v224_v0  ;;  %81 = vmatpush.msra.mxu0 %v61_v1  ;;  %131 = vmatpush.msra.mxu1 %v61_v1  ;;  %v59_v3 = vld [vmem:[#allocation6 + $0x8] sm:$0xff]  ;;  %v58_v4 = vld [vmem:[#allocation6] sm:$0xff]  ;;  %v56_v5 = vld [vmem:[#allocation3] sm:$0xff]  ;;  %s225_s24 = smov [#allocation8]   ;;  %s115_s28 = sshll.u32 %s278_s3, 4  ;;  %s116_s28 = int_to_ptr.hbm [resolvable:$true] %s115_s28 }
   0xe   :  { %53 = vst.msk [vmem:[#allocation2 + $0x8] sm:$0xff] %vm51_vm0, %v224_v0  ;;  %v57_v6 = vld [vmem:[#allocation3 + $0x8] sm:$0xff]  ;;  %v141_v13 = vld [vmem:[%s277_s2] ss:$0 sm:$0xff]  ;;  %s113_s25 = sshll.u32 %s225_s24, 4  ;;  %s114_s25 = int_to_ptr.vmem [resolvable:$true] %s113_s25 }
   0xf   :  { %82 = vmatpush.msra.mxu0 %v60_v2  ;;  %132 = vmatpush.msra.mxu1 %v60_v2 }
  0x11   :  { %83 = vmatpush.msra.mxu0 %v59_v3  ;;  %133 = vmatpush.msra.mxu1 %v59_v3 }
  0x13   :  { %84 = vmatpush.msra.mxu0 %v58_v4  ;;  %134 = vmatpush.msra.mxu1 %v58_v4 }
  0x14   :  { %129 = vmatmul.msk.f32.vlgmr.msra.gmra.mxu0 %vm51_vm0, %v56_v5  ;;  %130 = vmatmul.msk.f32.vlgmr.msra.gmra.mxu1 %vm51_vm0, %v57_v6  ;;  %v54_v7 = vld [vmem:[#allocation2] sm:$0xff] }
  0x15   :  { %v55_v8 = vld [vmem:[#allocation2 + $0x8] sm:$0xff] }
  0x91   :  { %v86_v9 = vpop.f32.mrf.mxu0  ;;  %v89_v10 = vpop.f32.mrf.mxu1 }
  0x92   :  { %v92_v11 = vadd.f32 %v86_v9, %v54_v7  ;;  %v93_v12 = vadd.f32 %v89_v10, %v55_v8 }
  0x94   :  { %94 = vst.msk [vmem:[#allocation2] sm:$0xff] %vm51_vm0, %v92_v11 }
  0x95   :  { %95 = vst.msk [vmem:[#allocation2 + $0x8] sm:$0xff] %vm51_vm0, %v93_v12 }
  0x9b   :  { %v99_v14 = vld [vmem:[#allocation2] sm:$0xff] }
  0x9c   :  { %v100_v15 = vld [vmem:[#allocation2 + $0x8] sm:$0xff]  ;;  %v105_v16 = vadd.f32 %v141_v13, %v99_v14 }
  0x9d   :  { %v106_v17 = vadd.f32 %v141_v13, %v100_v15 }
  0x9e   :  { %107 = vst.msk [vmem:[#allocation8] sm:$0xff] %vm51_vm0, %v105_v16 }
  0x9f   :  { %108 = vst.msk [vmem:[#allocation8 + $0x8] sm:$0xff] %vm51_vm0, %v106_v17 }
  0xa0   :  { %121 = dma.vmem_to_hbm [thread:$0]  %s114_s25, 256, %s116_s28, [#allocation5], %s221_s20, %s221_s20, %s222_s21  }
  0xa1   :  { %218 = dma.done.wait [#allocation5], 256  }
  0xa2   :  { %219 = vsyncadd [#allocation5], 4294967040 }
  0xa3   :  { %126 = vsyncpa [#allocation4], 1 }
  0xa4   :  { %127 = vsyncpa [#allocation7], 1 }
  0xa5   :  { %128 = vsyncpa [#allocation5], 1 }

</bundles_post_ra>
